<compile_context>
chip_gen: v6e
topology: v6e:2x2x1
jax: 0.10.0
libtpu: 0.0.40
codegen_flags: <defaults>
</compile_context>

<pallas_src>
import jax
import jax.numpy as jnp
from jax import lax
from jax.experimental import pallas as pl
from jax.experimental.pallas import tpu as pltpu


def _er_score_kernel(hi_ref, ri_ref, ti_ref, latT_ref, relT_ref,
                     whT_ref, bhT_ref, wtT_ref, btT_ref, o_ref):
    """Fused gather + head/tail projection + DistMult interaction.

    Everything is feature-major so the batch tile sits on the lane axis.

    hi_ref, ri_ref, ti_ref : [1, TB] int32   head / relation / tail indices
    latT_ref : [L, E] bf16   latent-state table, transposed (VMEM-resident)
    relT_ref : [D, R] f32    relation embedding table, transposed (resident)
    whT_ref  : [D, L] bf16   head projection weight (transposed, resident)
    bhT_ref  : [D, 1] f32    head bias (resident)
    wtT_ref  : [D, L] bf16   tail projection weight (transposed, resident)
    btT_ref  : [D, 1] f32    tail bias (resident)
    o_ref    : [1, TB] f32   scores (lane-dense)
    """
    E = latT_ref.shape[1]
    R = relT_ref.shape[1]
    TB = o_ref.shape[1]

    # One-hot gather matrices, built directly in transposed [table_rows, TB]
    # orientation (batch on lanes).  0/1 are exact in bf16.
    ent_ids = lax.broadcasted_iota(jnp.int32, (E, TB), 0)
    rel_ids = lax.broadcasted_iota(jnp.int32, (R, TB), 0)
    oh_h = (hi_ref[...] == ent_ids).astype(jnp.bfloat16)      # [E, TB]
    oh_t = (ti_ref[...] == ent_ids).astype(jnp.bfloat16)      # [E, TB]
    oh_r = (ri_ref[...] == rel_ids).astype(jnp.float32)       # [R, TB]

    # Fused gathers via MXU matmuls against the VMEM-resident tables.
    h_lat = jnp.dot(latT_ref[...], oh_h,
                    preferred_element_type=jnp.float32)        # [L, TB]
    t_lat = jnp.dot(latT_ref[...], oh_t,
                    preferred_element_type=jnp.float32)        # [L, TB]
    r = jnp.dot(relT_ref[...], oh_r,
                preferred_element_type=jnp.float32)            # [D, TB] (exact)

    # Head / tail projections: bf16 MXU operands, f32 accumulation + f32 bias.
    h = jnp.dot(whT_ref[...], h_lat.astype(jnp.bfloat16),
                preferred_element_type=jnp.float32) + bhT_ref[...]   # [D, TB]
    t = jnp.dot(wtT_ref[...], t_lat.astype(jnp.bfloat16),
                preferred_element_type=jnp.float32) + btT_ref[...]   # [D, TB]

    # DistMult interaction in f32; sublane reduce over the feature dim gives a
    # lane-dense [1, TB] score row → unmasked vector stores.
    o_ref[...] = jnp.sum(h * r * t, axis=0, keepdims=True)


def er_model_score_hrt(latent_states, rel_emb, w_h, b_h, w_t, b_t,
                       hs, rs, ts, *, block_b=128):
    """ERModel.score_hrt equivalent.

    latent_states : [num_entities, L] float32
    rel_emb       : [num_relations, D] float32
    w_h, w_t      : [L, D] float32 ;  b_h, b_t : [1, D] float32
    hs, rs, ts    : [B] int32 index vectors
    returns       : [B, 1] float32 scores
    """
    E, L = latent_states.shape
    R, D = rel_emb.shape
    B = int(hs.shape[0])

    TB = int(block_b)                       # multiple of 128 → lane-dense tiles
    n_tiles = pl.cdiv(B, TB)
    B_pad = n_tiles * TB
    pad = B_pad - B

    def prep_idx(idx):
        idx = idx.astype(jnp.int32)
        if pad:
            idx = jnp.pad(idx, (0, pad))    # pad with a valid index (0)
        return idx.reshape(1, B_pad)

    hi = prep_idx(hs)
    ri = prep_idx(rs)
    ti = prep_idx(ts)

    # One-time layout plumbing in the wrapper: feature-major tables/weights and
    # bf16 casts for the MXU operands.  Relation table stays f32 (exact gather,
    # f32 elementwise interaction).
    latT = latent_states.T.astype(jnp.bfloat16)     # [L, E]
    relT = rel_emb.T                                # [D, R]
    whT = w_h.T.astype(jnp.bfloat16)                # [D, L]
    wtT = w_t.T.astype(jnp.bfloat16)                # [D, L]
    bhT = b_h.T                                     # [D, 1]
    btT = b_t.T                                     # [D, 1]

    def resident(shape):
        # Same block on every grid step ⇒ stays in VMEM across steps.
        return pl.BlockSpec(shape, lambda i: (0,) * len(shape))

    batch_spec = pl.BlockSpec((1, TB), lambda i: (0, i))

    out = pl.pallas_call(
        _er_score_kernel,
        out_shape=jax.ShapeDtypeStruct((1, B_pad), jnp.float32),
        grid_spec=pltpu.PrefetchScalarGridSpec(
            num_scalar_prefetch=0,
            grid=(n_tiles,),
            in_specs=[
                batch_spec,            # head indices   [1, B_pad] → [1, TB]
                batch_spec,            # rel indices
                batch_spec,            # tail indices
                resident((L, E)),      # latent table (bf16)
                resident((D, R)),      # relation table (f32)
                resident((D, L)),      # W_h^T (bf16)
                resident((D, 1)),      # b_h^T
                resident((D, L)),      # W_t^T (bf16)
                resident((D, 1)),      # b_t^T
            ],
            out_specs=batch_spec,      # scores, lane-dense [1, TB]
        ),
        compiler_params=pltpu.CompilerParams(
            dimension_semantics=("parallel",)),
    )(hi, ri, ti, latT, relT, whT, bhT, wtT, btT)

    return out[0, :B].reshape(B, 1)


def _reference(latent_states, rel_emb, w_h, b_h, w_t, b_t, hs, rs, ts):
    # Matches the kernel's numerics: bf16 matmul operands, f32 accumulation,
    # f32 bias / elementwise interaction.
    h_lat = jnp.take(latent_states.astype(jnp.bfloat16), hs, axis=0)
    t_lat = jnp.take(latent_states.astype(jnp.bfloat16), ts, axis=0)
    r = jnp.take(rel_emb, rs, axis=0)
    h = jnp.dot(h_lat, w_h.astype(jnp.bfloat16),
                preferred_element_type=jnp.float32) + b_h
    t = jnp.dot(t_lat, w_t.astype(jnp.bfloat16),
                preferred_element_type=jnp.float32) + b_t
    return jnp.sum(h * r * t, axis=-1, keepdims=True)


if __name__ == "__main__":
    # Small, forward-consistent shapes.
    num_entities = 32
    num_relations = 16
    latent_dim = 32     # L
    embed_dim = 32      # D
    batch = 8           # B

    key = jax.random.PRNGKey(0)
    k_lat, k_rel, k_wh, k_wt, k_bh, k_bt, k_h, k_r, k_t = jax.random.split(key, 9)

    # Deterministic parameter / input initialization (no checkpoint loading).
    latent_states = jax.random.normal(k_lat, (num_entities, latent_dim),
                                      jnp.float32)
    rel_emb = jax.random.normal(k_rel, (num_relations, embed_dim), jnp.float32)
    w_h = jax.random.normal(k_wh, (latent_dim, embed_dim), jnp.float32) * 0.1
    w_t = jax.random.normal(k_wt, (latent_dim, embed_dim), jnp.float32) * 0.1
    b_h = jax.random.normal(k_bh, (1, embed_dim), jnp.float32) * 0.01
    b_t = jax.random.normal(k_bt, (1, embed_dim), jnp.float32) * 0.01

    hs = jax.random.randint(k_h, (batch,), 0, num_entities, jnp.int32)
    rs = jax.random.randint(k_r, (batch,), 0, num_relations, jnp.int32)
    ts = jax.random.randint(k_t, (batch,), 0, num_entities, jnp.int32)

    scores = er_model_score_hrt(latent_states, rel_emb, w_h, b_h, w_t, b_t,
                                hs, rs, ts)
    scores = jax.block_until_ready(scores)

    ref = _reference(latent_states, rel_emb, w_h, b_h, w_t, b_t, hs, rs, ts)
    assert scores.shape == (batch, 1)
    assert jnp.allclose(scores, ref, atol=1e-3, rtol=1e-3), (scores, ref)

    print("KERNEL_OK")
</pallas_src>

<mosaic_0001>
module attributes {stable_mosaic.version = 11 : i64} {
  func.func @_er_score_kernel(%arg0: i32, %arg1: memref<1x128xi32, #tpu.memory_space<vmem>>, %arg2: memref<1x128xi32, #tpu.memory_space<vmem>>, %arg3: memref<1x128xi32, #tpu.memory_space<vmem>>, %arg4: memref<32x32xbf16, #tpu.memory_space<vmem>>, %arg5: memref<32x16xf32, #tpu.memory_space<vmem>>, %arg6: memref<32x32xbf16, #tpu.memory_space<vmem>>, %arg7: memref<32x1xf32, #tpu.memory_space<vmem>>, %arg8: memref<32x32xbf16, #tpu.memory_space<vmem>>, %arg9: memref<32x1xf32, #tpu.memory_space<vmem>>, %arg10: memref<1x128xf32, #tpu.memory_space<vmem>>) attributes {dimension_semantics = [#tpu.dimension_semantics<parallel>], iteration_bounds = array<i64: 1>, scalar_prefetch = 0 : i64, scratch_operands = 0 : i64, tpu.core_type = #tpu.core_type<tc>, window_params = [{transform_indices = @transform_0, window_bounds = array<i64: 1, 128>}, {transform_indices = @transform_1, window_bounds = array<i64: 1, 128>}, {transform_indices = @transform_2, window_bounds = array<i64: 1, 128>}, {pipeline_mode = #tpu.pipeline_mode<synchronous>, transform_indices = @transform_3, window_bounds = array<i64: 32, 32>}, {pipeline_mode = #tpu.pipeline_mode<synchronous>, transform_indices = @transform_4, window_bounds = array<i64: 32, 16>}, {pipeline_mode = #tpu.pipeline_mode<synchronous>, transform_indices = @transform_5, window_bounds = array<i64: 32, 32>}, {pipeline_mode = #tpu.pipeline_mode<synchronous>, transform_indices = @transform_6, window_bounds = array<i64: 32, 1>}, {pipeline_mode = #tpu.pipeline_mode<synchronous>, transform_indices = @transform_7, window_bounds = array<i64: 32, 32>}, {pipeline_mode = #tpu.pipeline_mode<synchronous>, transform_indices = @transform_8, window_bounds = array<i64: 32, 1>}, {transform_indices = @transform_9, window_bounds = array<i64: 1, 128>}]} {
    %0 = tpu.iota {dimensions = array<i32: 0>} : vector<32x128xi32>
    %1 = tpu.iota {dimensions = array<i32: 0>} : vector<16x128xi32>
    %c0 = arith.constant 0 : index
    %c0_0 = arith.constant 0 : index
    %2 = vector.load %arg1[%c0, %c0_0] : memref<1x128xi32, #tpu.memory_space<vmem>>, vector<1x128xi32>
    %3 = vector.broadcast %2 : vector<1x128xi32> to vector<32x128xi32>
    %4 = arith.cmpi eq, %3, %0 : vector<32x128xi32>
    %5 = arith.extui %4 : vector<32x128xi1> to vector<32x128xi32>
    %6 = arith.sitofp %5 : vector<32x128xi32> to vector<32x128xf32>
    %7 = arith.truncf %6 : vector<32x128xf32> to vector<32x128xbf16>
    %c0_1 = arith.constant 0 : index
    %c0_2 = arith.constant 0 : index
    %8 = vector.load %arg3[%c0_1, %c0_2] : memref<1x128xi32, #tpu.memory_space<vmem>>, vector<1x128xi32>
    %9 = vector.broadcast %8 : vector<1x128xi32> to vector<32x128xi32>
    %10 = arith.cmpi eq, %9, %0 : vector<32x128xi32>
    %11 = arith.extui %10 : vector<32x128xi1> to vector<32x128xi32>
    %12 = arith.sitofp %11 : vector<32x128xi32> to vector<32x128xf32>
    %13 = arith.truncf %12 : vector<32x128xf32> to vector<32x128xbf16>
    %c0_3 = arith.constant 0 : index
    %c0_4 = arith.constant 0 : index
    %14 = vector.load %arg2[%c0_3, %c0_4] : memref<1x128xi32, #tpu.memory_space<vmem>>, vector<1x128xi32>
    %15 = vector.broadcast %14 : vector<1x128xi32> to vector<16x128xi32>
    %16 = arith.cmpi eq, %15, %1 : vector<16x128xi32>
    %17 = arith.extui %16 : vector<16x128xi1> to vector<16x128xi32>
    %18 = arith.sitofp %17 : vector<16x128xi32> to vector<16x128xf32>
    %c0_5 = arith.constant 0 : index
    %c0_6 = arith.constant 0 : index
    %19 = vector.load %arg4[%c0_5, %c0_6] : memref<32x32xbf16, #tpu.memory_space<vmem>>, vector<32x32xbf16>
    %cst = arith.constant dense<0.000000e+00> : vector<32x128xf32>
    %20 = tpu.matmul %19, %7, %cst {dimension_numbers = #tpu.dot_dimension_numbers<[1], [0], [0], [1], [0, 0, 1, 1], [], []>} : vector<32x32xbf16>, vector<32x128xbf16>, vector<32x128xf32> -> vector<32x128xf32>
    %c0_7 = arith.constant 0 : index
    %c0_8 = arith.constant 0 : index
    %21 = vector.load %arg4[%c0_7, %c0_8] : memref<32x32xbf16, #tpu.memory_space<vmem>>, vector<32x32xbf16>
    %cst_9 = arith.constant dense<0.000000e+00> : vector<32x128xf32>
    %22 = tpu.matmul %21, %13, %cst_9 {dimension_numbers = #tpu.dot_dimension_numbers<[1], [0], [0], [1], [0, 0, 1, 1], [], []>} : vector<32x32xbf16>, vector<32x128xbf16>, vector<32x128xf32> -> vector<32x128xf32>
    %c0_10 = arith.constant 0 : index
    %c0_11 = arith.constant 0 : index
    %23 = vector.load %arg5[%c0_10, %c0_11] : memref<32x16xf32, #tpu.memory_space<vmem>>, vector<32x16xf32>
    %cst_12 = arith.constant dense<0.000000e+00> : vector<32x128xf32>
    %24 = tpu.matmul %23, %18, %cst_12 {dimension_numbers = #tpu.dot_dimension_numbers<[1], [0], [0], [1], [0, 0, 1, 1], [], []>} : vector<32x16xf32>, vector<16x128xf32>, vector<32x128xf32> -> vector<32x128xf32>
    %c0_13 = arith.constant 0 : index
    %c0_14 = arith.constant 0 : index
    %25 = vector.load %arg6[%c0_13, %c0_14] : memref<32x32xbf16, #tpu.memory_space<vmem>>, vector<32x32xbf16>
    %26 = arith.truncf %20 : vector<32x128xf32> to vector<32x128xbf16>
    %cst_15 = arith.constant dense<0.000000e+00> : vector<32x128xf32>
    %27 = tpu.matmul %25, %26, %cst_15 {dimension_numbers = #tpu.dot_dimension_numbers<[1], [0], [0], [1], [0, 0, 1, 1], [], []>} : vector<32x32xbf16>, vector<32x128xbf16>, vector<32x128xf32> -> vector<32x128xf32>
    %c0_16 = arith.constant 0 : index
    %c0_17 = arith.constant 0 : index
    %28 = vector.load %arg7[%c0_16, %c0_17] : memref<32x1xf32, #tpu.memory_space<vmem>>, vector<32x1xf32>
    %29 = vector.broadcast %28 : vector<32x1xf32> to vector<32x128xf32>
    %30 = arith.addf %27, %29 : vector<32x128xf32>
    %c0_18 = arith.constant 0 : index
    %c0_19 = arith.constant 0 : index
    %31 = vector.load %arg8[%c0_18, %c0_19] : memref<32x32xbf16, #tpu.memory_space<vmem>>, vector<32x32xbf16>
    %32 = arith.truncf %22 : vector<32x128xf32> to vector<32x128xbf16>
    %cst_20 = arith.constant dense<0.000000e+00> : vector<32x128xf32>
    %33 = tpu.matmul %31, %32, %cst_20 {dimension_numbers = #tpu.dot_dimension_numbers<[1], [0], [0], [1], [0, 0, 1, 1], [], []>} : vector<32x32xbf16>, vector<32x128xbf16>, vector<32x128xf32> -> vector<32x128xf32>
    %c0_21 = arith.constant 0 : index
    %c0_22 = arith.constant 0 : index
    %34 = vector.load %arg9[%c0_21, %c0_22] : memref<32x1xf32, #tpu.memory_space<vmem>>, vector<32x1xf32>
    %35 = vector.broadcast %34 : vector<32x1xf32> to vector<32x128xf32>
    %36 = arith.addf %33, %35 : vector<32x128xf32>
    %37 = arith.mulf %30, %24 : vector<32x128xf32>
    %38 = arith.mulf %37, %36 : vector<32x128xf32>
    %cst_23 = arith.constant dense<0.000000e+00> : vector<128xf32>
    %39 = vector.multi_reduction <add>, %38, %cst_23 [0] : vector<32x128xf32> to vector<128xf32>
    %40 = vector.shape_cast %39 : vector<128xf32> to vector<1x128xf32>
    %c0_24 = arith.constant 0 : index
    %c0_25 = arith.constant 0 : index
    %41 = vector.load %arg10[%c0_24, %c0_25] : memref<1x128xf32, #tpu.memory_space<vmem>>, vector<1x128xf32>
    tpu.vector_store %arg10[%c0_24, %c0_25], %40 {strides = array<i32>} : memref<1x128xf32, #tpu.memory_space<vmem>>, vector<1x128xf32>,
    return
  }
  func.func @transform_0(%arg0: i32) -> (i32, i32) {
    %c0_i32 = arith.constant 0 : i32
    %c0_i32_0 = arith.constant 0 : i32
    return %c0_i32, %arg0 : i32, i32
  }
  func.func @transform_1(%arg0: i32) -> (i32, i32) {
    %c0_i32 = arith.constant 0 : i32
    %c0_i32_0 = arith.constant 0 : i32
    return %c0_i32, %arg0 : i32, i32
  }
  func.func @transform_2(%arg0: i32) -> (i32, i32) {
    %c0_i32 = arith.constant 0 : i32
    %c0_i32_0 = arith.constant 0 : i32
    return %c0_i32, %arg0 : i32, i32
  }
  func.func @transform_3(%arg0: i32) -> (i32, i32) {
    %c0_i32 = arith.constant 0 : i32
    %c0_i32_0 = arith.constant 0 : i32
    %c0_i32_1 = arith.constant 0 : i32
    return %c0_i32, %c0_i32_0 : i32, i32
  }
  func.func @transform_4(%arg0: i32) -> (i32, i32) {
    %c0_i32 = arith.constant 0 : i32
    %c0_i32_0 = arith.constant 0 : i32
    %c0_i32_1 = arith.constant 0 : i32
    return %c0_i32, %c0_i32_0 : i32, i32
  }
  func.func @transform_5(%arg0: i32) -> (i32, i32) {
    %c0_i32 = arith.constant 0 : i32
    %c0_i32_0 = arith.constant 0 : i32
    %c0_i32_1 = arith.constant 0 : i32
    return %c0_i32, %c0_i32_0 : i32, i32
  }
  func.func @transform_6(%arg0: i32) -> (i32, i32) {
    %c0_i32 = arith.constant 0 : i32
    %c0_i32_0 = arith.constant 0 : i32
    %c0_i32_1 = arith.constant 0 : i32
    return %c0_i32, %c0_i32_0 : i32, i32
  }
  func.func @transform_7(%arg0: i32) -> (i32, i32) {
    %c0_i32 = arith.constant 0 : i32
    %c0_i32_0 = arith.constant 0 : i32
    %c0_i32_1 = arith.constant 0 : i32
    return %c0_i32, %c0_i32_0 : i32, i32
  }
  func.func @transform_8(%arg0: i32) -> (i32, i32) {
    %c0_i32 = arith.constant 0 : i32
    %c0_i32_0 = arith.constant 0 : i32
    %c0_i32_1 = arith.constant 0 : i32
    return %c0_i32, %c0_i32_0 : i32, i32
  }
  func.func @transform_9(%arg0: i32) -> (i32, i32) {
    %c0_i32 = arith.constant 0 : i32
    %c0_i32_0 = arith.constant 0 : i32
    return %c0_i32, %arg0 : i32, i32
  }
}

</mosaic_0001>

<bundles_post_ra>
// kernel: tpu_custom_call.1
= control target key start
LH: loop header
LB: loop body
LE: loop exit
PB: predicated region body
PF: predicated region fallthrough
CT: control target
= control target key end

     0   :  { %v34_v0 = vlaneseq  ;;  %vm102_vm0 = vcmask 261120   ;;  %s799_s0 = inlined_call_operand.vmem [shape: s32[1,128], index: 0, kind: input, shape index: {}]   ;;  %s800_s1 = inlined_call_operand.vmem [shape: s32[1,128], index: 1, kind: input, shape index: {}]   ;;  %s801_s2 = inlined_call_operand.vmem [shape: s32[1,128], index: 2, kind: input, shape index: {}]   ;;  %s802_s3 = inlined_call_operand.vmem [shape: bf16[32,32], index: 3, kind: input, shape index: {}]   ;;  %s803_s4 = inlined_call_operand.vmem [shape: f32[32,16], index: 4, kind: input, shape index: {}]   ;;  %s804_s5 = inlined_call_operand.vmem [shape: bf16[32,32], index: 5, kind: input, shape index: {}]   ;;  %s805_s6 = inlined_call_operand.vmem [shape: f32[32,1], index: 6, kind: input, shape index: {}]   ;;  %s806_s7 = inlined_call_operand.vmem [shape: bf16[32,32], index: 7, kind: input, shape index: {}]   ;;  %s807_s8 = inlined_call_operand.vmem [shape: f32[32,1], index: 8, kind: input, shape index: {}]   ;;  %s808_s9 = inlined_call_operand.hbm [shape: f32[1,128], index: 9, kind: output, shape index: {}]  }
   0x1   :  { %v531_v1 = vld [vmem:[%s799_s0] ss:$0 sm:$0xff] }
   0x2   :  { %v536_v2 = vld [vmem:[%s801_s2] ss:$0 sm:$0xff]  ;;  %v35_v4 = vshrl.u32 %v34_v0, 7 }
   0x3   :  { %v642_v3 = vld [vmem:[%s802_s3] sm:$0xff]  }
   0x4   :  { %598 = vmatprep.mubr.msk.bf16.mxu0 %vm102_vm0, %v642_v3  ;;  %606 = vmatprep.mubr.msk.bf16.mxu1 %vm102_vm0, %v642_v3  ;;  %v37_v5 = vadd.s32 16, %v35_v4  ;;  %v38_v6 = vadd.s32 24, %v35_v4  ;;  %v36_v7 = vadd.s32 8, %v35_v4  ;;  %vm44_vm1 = vcmp.eq.s32.totalorder %v531_v1, %v35_v4 }
   0x6   :  { %vm46_vm2 = vcmp.eq.s32.totalorder %v531_v1, %v37_v5  ;;  %vm47_vm3 = vcmp.eq.s32.totalorder %v531_v1, %v38_v6  ;;  %vm65_vm4 = vcmp.eq.s32.totalorder %v536_v2, %v37_v5  ;;  %vm66_vm5 = vcmp.eq.s32.totalorder %v536_v2, %v38_v6 }
   0x7   :  { %14 = vsyncpa [#allocation3], 0  ;;  %vm45_vm7 = vcmp.eq.s32.totalorder %v531_v1, %v36_v7  ;;  %vm63_vm8 = vcmp.eq.s32.totalorder %v536_v2, %v35_v4  ;;  %vm64_vm9 = vcmp.eq.s32.totalorder %v536_v2, %v36_v7  ;;  %v670_v8 = vmov 1.0|1.0   ;;  %v643_v9 = vld [vmem:[%s802_s3 + $0x8] sm:$0xff]   ;;  %v207_v12 = vld [vmem:[%s803_s4] sm:$0xff] }
   0x8   :  { %vm546_vm6 = vmpackc.low %vm47_vm3, %vm46_vm2  ;;  %v541_v10 = vld [vmem:[%s800_s1] ss:$0 sm:$0xff]  ;;  %v671_v11 = vmov 1.0   ;;  %vm211_vm15 = vcmask 130048   ;;  %v208_v13 = vld [vmem:[%s803_s4 + $0x8] sm:$0xff]  ;;  %v672_v20 = vmov 0  }
   0x9   :  { %594 = vmatprep.subr.msk.bf16.mxu0 %vm546_vm6, %v670_v8  ;;  %vm552_vm10 = vmpackc.low %vm66_vm5, %vm65_vm4  ;;  %vm83_vm13 = vcmp.eq.s32.totalorder %v541_v10, %v36_v7  ;;  %vm82_vm14 = vcmp.eq.s32.totalorder %v541_v10, %v35_v4  ;;  %v209_v14 = vld [vmem:[%s803_s4 + $0x10] sm:$0xff]  ;;  %v210_v15 = vld [vmem:[%s803_s4 + $0x18] sm:$0xff]  ;;  %640 = vset.pattern.permute.xlu0 %v672_v20 }
   0xa   :  { %602 = vmatprep.subr.msk.bf16.mxu1 %vm552_vm10, %v670_v8  ;;  %595 = vmatpush3.bf16.msk.msra.mxu0 %vm546_vm6, %v670_v8  ;;  %vm548_vm11 = vmpackc.low %vm45_vm7, %vm44_vm1  ;;  %v644_v16 = vld [vmem:[%s804_s5] sm:$0xff]   ;;  %v317_v19 = vld [vmem:[%s805_s6 + $0x10] sm:$0xff] }
   0xb   :  { %603 = vmatpush3.bf16.msk.msra.mxu1 %vm552_vm10, %v670_v8  ;;  %596 = vmatprep.subr.msk.bf16.mxu0 %vm548_vm11, %v670_v8  ;;  %vm554_vm12 = vmpackc.low %vm64_vm9, %vm63_vm8  ;;  %v645_v17 = vld [vmem:[%s806_s7] sm:$0xff]   ;;  %v316_v21 = vld [vmem:[%s805_s6 + $0x8] sm:$0xff] }
   0xc   :  { %604 = vmatprep.subr.msk.bf16.mxu1 %vm554_vm12, %v670_v8  ;;  %v315_v18 = vld [vmem:[%s805_s6] sm:$0xff]  ;;  %641 = vset.pattern.permute.xlu1 %v672_v20  ;;  %v411_v23 = vld [vmem:[%s807_s8 + $0x8] sm:$0xff]  ;;  %v318_v24 = vld [vmem:[%s805_s6 + $0x18] sm:$0xff] }
   0xd   :  { %321 = vperm.xlu0 %640, %v315_v18   ;;  %331 = vperm.xlu1 %641, %v317_v19   ;;  %v410_v22 = vld [vmem:[%s807_s8] sm:$0xff]  ;;  %v412_v25 = vld [vmem:[%s807_s8 + $0x10] sm:$0xff]  ;;  %v413_v26 = vld [vmem:[%s807_s8 + $0x18] sm:$0xff] }
   0xe   :  { %597 = vmatpush3.bf16.msk.msra.mxu0 %vm548_vm11, %v670_v8  ;;  %v646_v39 = vld [vmem:[%s804_s5 + $0x8] sm:$0xff]   ;;  %s673_s5 = smov [#allocation2]  }
   0xf   :  { %605 = vmatpush3.bf16.msk.msra.mxu1 %vm554_vm12, %v670_v8  ;;  %610 = vmatprep.subr.msk.mxu0 %vm83_vm13, %v671_v11  ;;  %v647_v40 = vld [vmem:[%s806_s7 + $0x8] sm:$0xff]   ;;  %s523_s7 = sshll.u32 %s673_s5, 4  ;;  %s524_s7 = int_to_ptr.vmem [resolvable:$true] %s523_s7 }
  0x10   :  { %s648_s20 = scalar_lea.vmem %s524_s7, 16  ;;  %s652_s1 = scalar_lea.vmem %s524_s7, 32 }
  0x11   :  { %599 = vmatmul.mubr.msk.bf16.vlgmr.msra.gmra.mxu0 %vm102_vm0, %v643_v9  ;;  %326 = vperm.xlu0 %640, %v316_v21   ;;  %p649_p0 = scmp.ne.s32.totalorder %s524_s7, %s648_s20  ;;  %p653_p1 = scmp.lt.s32.totalorder %s524_s7, %s524_s7 }
  0x12   :  { %607 = vmatmul.mubr.msk.bf16.vlgmr.msra.gmra.mxu1 %vm102_vm0, %v643_v9  ;;  %611 = vmatpush3.msk.msra.mxu0 %vm83_vm13, %v671_v11  ;;  %p654_p2 = scmp.lt.s32.totalorder %s652_s1, %s648_s20 }
  0x13   :  { %612 = vmatprep.subr.msk.mxu0 %vm82_vm14, %v671_v11  ;;  %614 = vmatprep.mubr.msk.f32.mxu0 %vm211_vm15, %v207_v12 }
  0x14   :  { %613 = vmatpush3.msk.msra.mxu0 %vm82_vm14, %v671_v11  ;;  %624 = vmatprep.mubr.msk.bf16.mxu1 %vm102_vm0, %v644_v16  ;;  %p655_p3 = por %p654_p2, %p653_p1 }
  0x15   :  { %416 = vperm.xlu1 %641, %v410_v22   ;;  %421 = vperm.xlu0 %640, %v411_v23  }
  0x16   :  { %p656_p4 = pnand %p655_p3, %p649_p0 }
  0x19   :  { %615 = vmatmul.mubr.msk.f32.vlgmr.msra.gmra.mxu0 %vm211_vm15, %v208_v13  ;;  %336 = vperm.xlu1 %641, %v318_v24  }
  0x1a   :  { %617 = vmatprep.mubr.msk.f32.mxu0 %vm211_vm15, %v209_v14  ;;  %426 = vperm.xlu0 %640, %v412_v25  }
  0x1d   :  { %618 = vmatmul.mubr.msk.f32.gmra.mxu0 %vm211_vm15, %v210_v15  ;;  %431 = vperm.xlu1 %641, %v413_v26  }
  0x1e   :  { %632 = vmatprep.mubr.msk.bf16.mxu0 %vm102_vm0, %v645_v17 }
  0x88   :  { %v322_v43 = vpop.permute.xlu0 %321  ;;  %v332_v45 = vpop.permute.xlu1 %331 }
  0x8c   :  { %v327_v47 = vpop.permute.xlu0 %326 }
  0x90   :  { %v417_v48 = vpop.permute.xlu1 %416  ;;  %v422_v54 = vpop.permute.xlu0 %421 }
  0x94   :  { %v337_v58 = vpop.permute.xlu1 %336 }
  0x95   :  { %v427_v4 = vpop.permute.xlu0 %426 }
  0x98   :  { %v432_v9 = vpop.permute.xlu1 %431 }
  0xd1   :  { %v600_v27 = vpop.f32.mrf.mxu0 }
  0xd2   :  { %v608_v28 = vpop.f32.mrf.mxu1 }
  0xd3   :  { %v143_v29 = vpop.f32.mrf.mxu0 }
  0xd4   :  { %v192_v30 = vpop.f32.mrf.mxu1 }
  0xd5   :  { %v601_v31 = vpop.f32.mrf.mxu0 }
  0xd6   :  { %v314_v32 = vpack.c.bf16 %v601_v31, %v600_v27  ;;  %v609_v33 = vpop.f32.mrf.mxu1 }
  0xd7   :  { %v409_v34 = vpack.c.bf16 %v609_v33, %v608_v28  ;;  %v146_v35 = vpop.f32.mrf.mxu0 }
  0xd8   :  { %v313_v36 = vpack.c.bf16 %v146_v35, %v143_v29  ;;  %v195_v37 = vpop.f32.mrf.mxu1  ;;  %620 = vmatprep.subr.bf16.mxu1 %v314_v32 }
  0xd9   :  { %v408_v38 = vpack.c.bf16 %v195_v37, %v192_v30  ;;  %628 = vmatprep.subr.bf16.mxu0 %v409_v34  ;;  %621 = vmatpush3.bf16.msra.mxu1 %v314_v32  ;;  %v616_v41 = vpop.f32.mrf.mxu0 }
  0xda   :  { %629 = vmatpush3.bf16.msra.mxu0 %v409_v34  ;;  %622 = vmatprep.subr.bf16.mxu1 %v313_v36 }
  0xdb   :  { %630 = vmatprep.subr.bf16.mxu0 %v408_v38  ;;  %v290_v42 = vpop.f32.mrf.mxu0 }
  0xdd   :  { %623 = vmatpush3.bf16.msra.mxu1 %v313_v36  ;;  %v619_v44 = vpop.f32.mrf.mxu0 }
  0xde   :  { %631 = vmatpush3.bf16.msra.mxu0 %v408_v38 }
  0xdf   :  { %v300_v46 = vpop.f32.mrf.mxu0 }
  0xe0   :  { %625 = vmatmul.mubr.msk.bf16.vlgmr.msra.gmra.mxu1 %vm102_vm0, %v646_v39 }
  0xe1   :  { %633 = vmatmul.mubr.msk.bf16.vlgmr.msra.gmra.mxu0 %vm102_vm0, %v647_v40 }
 0x1a0   :  { %v626_v49 = vpop.f32.mrf.mxu1 }
 0x1a1   :  { %v634_v50 = vpop.f32.mrf.mxu0  ;;  %v398_v56 = vadd.f32 %v626_v49, %v332_v45 }
 0x1a2   :  { %v389_v51 = vpop.f32.mrf.mxu1  ;;  %v493_v5 = vadd.f32 %v634_v50, %v427_v4 }
 0x1a3   :  { %v390_v52 = vadd.f32 %v389_v51, %v322_v43  ;;  %v484_v53 = vpop.f32.mrf.mxu0  ;;  %v501_v0 = vmul.f32 %v398_v56, %v300_v46 }
 0x1a4   :  { %v627_v55 = vpop.f32.mrf.mxu1  ;;  %v485_v1 = vadd.f32 %v484_v53, %v417_v48 }
 0x1a5   :  { %v635_v57 = vpop.f32.mrf.mxu0  ;;  %v499_v60 = vmul.f32 %v390_v52, %v290_v42  ;;  %v401_v61 = vadd.f32 %v627_v55, %v337_v58  ;;  %v505_v10 = vmul.f32 %v501_v0, %v493_v5 }
 0x1a6   :  { %v392_v59 = vpop.f32.mrf.mxu1  ;;  %v496_v11 = vadd.f32 %v635_v57, %v432_v9 }
 0x1a7   :  { %v393_v62 = vadd.f32 %v392_v59, %v327_v47  ;;  %v487_v63 = vpop.f32.mrf.mxu0  ;;  %v503_v6 = vmul.f32 %v499_v60, %v485_v1  ;;  %v502_v7 = vmul.f32 %v619_v44, %v401_v61 }
 0x1a8   :  { %v488_v3 = vadd.f32 %v487_v63, %v422_v54 }
 0x1a9   :  { %v500_v2 = vmul.f32 %v616_v41, %v393_v62  ;;  %v506_v13 = vmul.f32 %v502_v7, %v496_v11 }
 0x1ab   :  { %v504_v8 = vmul.f32 %v500_v2, %v488_v3 }
 0x1ad   :  { %v507_v12 = vadd.f32 %v504_v8, %v503_v6 }
 0x1af   :  { %v508_v14 = vadd.f32 %v507_v12, %v505_v10 }
 0x1b1   :  { %v509_v15 = vadd.f32 %v508_v14, %v506_v13 }
 0x1b3   :  { %v510_v16 = vrot.slane %v509_v15, 4 }
 0x1b5   :  { %v511_v17 = vadd.f32 %v510_v16, %v509_v15 }
 0x1b7   :  { %v512_v18 = vrot.slane %v511_v17, 2 }
 0x1b9   :  { %v513_v19 = vadd.f32 %v512_v18, %v511_v17 }
 0x1bb   :  { %v514_v20 = vrot.slane %v513_v19, 1 }
 0x1bd   :  { %v515_v21 = vadd.f32 %v514_v20, %v513_v19 }
 0x1bf   :  { %516 = vst [vmem:[#allocation2] sm:$0x1] %v515_v21 }
 0x1c0   :  { %659 = shalt.err (!%p656_p4)
}
 0x1c1   :  { %526 = dma.vmem_to_hbm [thread:$0]  %s524_s7, 16, %s808_s9, [#allocation3]  }
 0x1c2   :  { %668 = dma.done.wait [#allocation3], 16  }
 0x1c3   :  { %669 = vsyncadd [#allocation3], 4294967280 }
 0x1c4   :  { %530 = vsyncpa [#allocation3], 1 }

</bundles_post_ra>
